<compile_context>
chip_gen: v7x
topology: tpu7x:2x2x1
jax: 0.10.0
libtpu: 0.0.40
codegen_flags: <defaults>
</compile_context>

<pallas_src>
import functools

import jax
import jax.numpy as jnp
from jax.experimental import pallas as pl
from jax.experimental.pallas import tpu as pltpu


def _round_up(x, m):
    return ((x + m - 1) // m) * m


def _patch_embed_kernel(x_ref, w_ref, b_ref, o_ref):
    # x_ref: (1, C, TN, P)   activation patches for this (batch, N-tile)
    # w_ref: (C, P, E_pad)   resident weight (same block every grid step)
    # b_ref: (1, E_pad)      resident bias (f32)
    # o_ref: (1, TN, E_pad)  output tile, stored directly in the final dtype
    n_chans = x_ref.shape[1]
    # C small per-channel matmuls (TN, P) @ (P, E_pad); f32 MXU accumulation.
    acc = jnp.dot(x_ref[0, 0], w_ref[0], preferred_element_type=jnp.float32)
    for c in range(1, n_chans):
        acc = acc + jnp.dot(x_ref[0, c], w_ref[c], preferred_element_type=jnp.float32)
    o_ref[0] = (acc + b_ref[...]).astype(o_ref.dtype)


def patch_embed_1d(x, weight, bias, patch_size, *, tile_n=512):
    """Pallas TPU PatchEmbed_1D.forward (norm_layer=None).

    x: (B, C, L); weight: (E, C, P) Conv1d weight; bias: (E,).
    Returns (B, N, E) with N = L // P.
    """
    B, C, L = x.shape
    E, C_w, P = weight.shape
    assert C_w == C and P == patch_size
    N = L // P
    assert N >= 1
    if L != N * P:                      # Conv1d with stride=P drops the ragged tail
        x = x[:, :, : N * P]

    # Metadata-only reshape; the patch "transpose" happens inside the kernel.
    x4 = x.reshape(B, C, N, P)

    compute_dtype = jnp.promote_types(x.dtype, weight.dtype)
    out_dtype = compute_dtype
    out_itemsize = jnp.dtype(out_dtype).itemsize

    # Lane-dense output: pad E up to a multiple of 128 only when necessary
    # (768 / 1024 / 1536 etc. need no padding and no trailing slice).
    E_pad = E if E % 128 == 0 else _round_up(E, 128)

    # Weight / bias prep is O(C*P*E) -- negligible.  w_t[c, p, e] = weight[e, c, p].
    w_t = jnp.transpose(weight, (1, 2, 0)).astype(compute_dtype)
    b_f32 = bias.astype(jnp.float32)
    if E_pad != E:
        w_t = jnp.pad(w_t, ((0, 0), (0, 0), (0, E_pad - E)))
        b_f32 = jnp.pad(b_f32, (0, E_pad - E))
    b_p = b_f32.reshape(1, E_pad)

    # Row tile along N.  Keep it a multiple of 8 (sublane rule) or the full dim.
    if N <= tile_n:
        TN = N
    else:
        TN = max(8, (tile_n // 8) * 8)
    grid_n = pl.cdiv(N, TN)
    # v7x has two TensorCores: make sure the "parallel" grid actually splits.
    if B * grid_n < 2 and N >= 16:
        TN = _round_up(pl.cdiv(N, 2), 8)
        grid_n = pl.cdiv(N, TN)

    # VMEM budget: double-buffered x and output tiles, resident weight/bias.
    # (x's P-wide lane dim is padded to 128 lanes in VMEM.)
    x_itemsize = jnp.dtype(x.dtype).itemsize
    w_itemsize = jnp.dtype(compute_dtype).itemsize

    def vmem_est(tn):
        x_blk = 2 * C * tn * 128 * x_itemsize
        o_blk = 2 * tn * E_pad * out_itemsize
        w_blk = 2 * C * max(P, 8) * E_pad * w_itemsize
        bias_blk = 2 * 8 * E_pad * 4
        return x_blk + o_blk + w_blk + bias_blk

    while TN > 8 and vmem_est(TN) > 40 * 1024 * 1024:
        TN = max(8, ((TN // 2) // 8) * 8)
        grid_n = pl.cdiv(N, TN)
    vmem_limit = int(min(64 * 1024 * 1024,
                         max(vmem_est(TN) + (4 << 20), 32 * 1024 * 1024)))

    cost = pl.CostEstimate(
        flops=2 * B * N * C * P * E_pad,
        transcendentals=0,
        bytes_accessed=(x4.size * x_itemsize
                        + w_t.size * w_itemsize
                        + b_p.size * 4
                        + B * N * E_pad * out_itemsize),
    )

    out = pl.pallas_call(
        _patch_embed_kernel,
        out_shape=jax.ShapeDtypeStruct((B, N, E_pad), out_dtype),
        grid=(B, grid_n),
        in_specs=[
            pl.BlockSpec((1, C, TN, P), lambda b, n: (b, 0, n, 0)),   # patches
            pl.BlockSpec((C, P, E_pad), lambda b, n: (0, 0, 0)),      # resident W
            pl.BlockSpec((1, E_pad), lambda b, n: (0, 0)),            # resident bias
        ],
        out_specs=pl.BlockSpec((1, TN, E_pad), lambda b, n: (b, n, 0)),
        compiler_params=pltpu.CompilerParams(
            dimension_semantics=("parallel", "parallel"),
            vmem_limit_bytes=vmem_limit,
        ),
        cost_estimate=cost,
    )(x4, w_t, b_p)

    return out if E_pad == E else out[:, :, :E]


if __name__ == "__main__":
    # Small shapes consistent with the module: B=2, in_chans=4, L(img_size)=16,
    # patch_size=2, embed_dim=32  ->  output (2, 8, 32).
    B, C, L = 2, 4, 16
    P, E = 2, 32

    key = jax.random.PRNGKey(0)
    kx, kw, kb = jax.random.split(key, 3)
    x = jax.random.normal(kx, (B, C, L), dtype=jnp.float32)
    weight = jax.random.normal(kw, (E, C, P), dtype=jnp.float32) * 0.1
    bias = jax.random.normal(kb, (E,), dtype=jnp.float32) * 0.1

    fn = jax.jit(functools.partial(patch_embed_1d, patch_size=P))
    out = jax.block_until_ready(fn(x, weight, bias))

    # Reference: Conv1d(stride=P, kernel=P) followed by transpose(1, 2), in f32.
    N = L // P
    ref = jnp.einsum("bcnp,ecp->bne", x.reshape(B, C, N, P), weight,
                     precision=jax.lax.Precision.HIGHEST) + bias[None, None, :]

    assert out.shape == (B, N, E), out.shape
    assert out.dtype == x.dtype, out.dtype
    err = float(jnp.max(jnp.abs(out - ref)))
    assert jnp.allclose(out, ref, atol=1e-2, rtol=1e-2), err
    print("KERNEL_OK")
</pallas_src>

<mosaic_0001>
module attributes {stable_mosaic.version = 11 : i64} {
  func.func @_patch_embed_kernel(%arg0: i32, %arg1: i32, %arg2: memref<1x4x8x2xf32, #tpu.memory_space<vmem>>, %arg3: memref<4x2x128xf32, #tpu.memory_space<vmem>>, %arg4: memref<1x128xf32, #tpu.memory_space<vmem>>, %arg5: memref<1x8x128xf32, #tpu.memory_space<vmem>>) attributes {dimension_semantics = [#tpu.dimension_semantics<parallel>, #tpu.dimension_semantics<parallel>], iteration_bounds = array<i64: 2, 1>, scalar_prefetch = 0 : i64, scratch_operands = 0 : i64, tpu.core_type = #tpu.core_type<tc>, window_params = [{transform_indices = @transform_0, window_bounds = array<i64: 1, 4, 8, 2>}, {pipeline_mode = #tpu.pipeline_mode<synchronous>, transform_indices = @transform_1, window_bounds = array<i64: 4, 2, 128>}, {pipeline_mode = #tpu.pipeline_mode<synchronous>, transform_indices = @transform_2, window_bounds = array<i64: 1, 128>}, {transform_indices = @transform_3, window_bounds = array<i64: 1, 8, 128>}]} {
    %c0 = arith.constant 0 : index
    %c0_0 = arith.constant 0 : index
    %c0_1 = arith.constant 0 : index
    %c0_2 = arith.constant 0 : index
    %0 = vector.load %arg2[%c0, %c0_0, %c0_1, %c0_2] : memref<1x4x8x2xf32, #tpu.memory_space<vmem>>, vector<1x1x8x2xf32>
    %1 = vector.shape_cast %0 : vector<1x1x8x2xf32> to vector<8x2xf32>
    %c0_3 = arith.constant 0 : index
    %c0_4 = arith.constant 0 : index
    %c0_5 = arith.constant 0 : index
    %2 = vector.load %arg3[%c0_3, %c0_4, %c0_5] : memref<4x2x128xf32, #tpu.memory_space<vmem>>, vector<1x2x128xf32>
    %3 = vector.shape_cast %2 : vector<1x2x128xf32> to vector<2x128xf32>
    %cst = arith.constant dense<0.000000e+00> : vector<8x128xf32>
    %4 = tpu.matmul %1, %3, %cst {dimension_numbers = #tpu.dot_dimension_numbers<[1], [0], [0], [1], [0, 0, 1, 1], [], []>} : vector<8x2xf32>, vector<2x128xf32>, vector<8x128xf32> -> vector<8x128xf32>
    %c0_6 = arith.constant 0 : index
    %c1 = arith.constant 1 : index
    %c0_7 = arith.constant 0 : index
    %c0_8 = arith.constant 0 : index
    %5 = vector.load %arg2[%c0_6, %c1, %c0_7, %c0_8] : memref<1x4x8x2xf32, #tpu.memory_space<vmem>>, vector<1x1x8x2xf32>
    %6 = vector.shape_cast %5 : vector<1x1x8x2xf32> to vector<8x2xf32>
    %c1_9 = arith.constant 1 : index
    %c0_10 = arith.constant 0 : index
    %c0_11 = arith.constant 0 : index
    %7 = vector.load %arg3[%c1_9, %c0_10, %c0_11] : memref<4x2x128xf32, #tpu.memory_space<vmem>>, vector<1x2x128xf32>
    %8 = vector.shape_cast %7 : vector<1x2x128xf32> to vector<2x128xf32>
    %cst_12 = arith.constant dense<0.000000e+00> : vector<8x128xf32>
    %9 = tpu.matmul %6, %8, %cst_12 {dimension_numbers = #tpu.dot_dimension_numbers<[1], [0], [0], [1], [0, 0, 1, 1], [], []>} : vector<8x2xf32>, vector<2x128xf32>, vector<8x128xf32> -> vector<8x128xf32>
    %10 = arith.addf %4, %9 : vector<8x128xf32>
    %c0_13 = arith.constant 0 : index
    %c2 = arith.constant 2 : index
    %c0_14 = arith.constant 0 : index
    %c0_15 = arith.constant 0 : index
    %11 = vector.load %arg2[%c0_13, %c2, %c0_14, %c0_15] : memref<1x4x8x2xf32, #tpu.memory_space<vmem>>, vector<1x1x8x2xf32>
    %12 = vector.shape_cast %11 : vector<1x1x8x2xf32> to vector<8x2xf32>
    %c2_16 = arith.constant 2 : index
    %c0_17 = arith.constant 0 : index
    %c0_18 = arith.constant 0 : index
    %13 = vector.load %arg3[%c2_16, %c0_17, %c0_18] : memref<4x2x128xf32, #tpu.memory_space<vmem>>, vector<1x2x128xf32>
    %14 = vector.shape_cast %13 : vector<1x2x128xf32> to vector<2x128xf32>
    %cst_19 = arith.constant dense<0.000000e+00> : vector<8x128xf32>
    %15 = tpu.matmul %12, %14, %cst_19 {dimension_numbers = #tpu.dot_dimension_numbers<[1], [0], [0], [1], [0, 0, 1, 1], [], []>} : vector<8x2xf32>, vector<2x128xf32>, vector<8x128xf32> -> vector<8x128xf32>
    %16 = arith.addf %10, %15 : vector<8x128xf32>
    %c0_20 = arith.constant 0 : index
    %c3 = arith.constant 3 : index
    %c0_21 = arith.constant 0 : index
    %c0_22 = arith.constant 0 : index
    %17 = vector.load %arg2[%c0_20, %c3, %c0_21, %c0_22] : memref<1x4x8x2xf32, #tpu.memory_space<vmem>>, vector<1x1x8x2xf32>
    %18 = vector.shape_cast %17 : vector<1x1x8x2xf32> to vector<8x2xf32>
    %c3_23 = arith.constant 3 : index
    %c0_24 = arith.constant 0 : index
    %c0_25 = arith.constant 0 : index
    %19 = vector.load %arg3[%c3_23, %c0_24, %c0_25] : memref<4x2x128xf32, #tpu.memory_space<vmem>>, vector<1x2x128xf32>
    %20 = vector.shape_cast %19 : vector<1x2x128xf32> to vector<2x128xf32>
    %cst_26 = arith.constant dense<0.000000e+00> : vector<8x128xf32>
    %21 = tpu.matmul %18, %20, %cst_26 {dimension_numbers = #tpu.dot_dimension_numbers<[1], [0], [0], [1], [0, 0, 1, 1], [], []>} : vector<8x2xf32>, vector<2x128xf32>, vector<8x128xf32> -> vector<8x128xf32>
    %22 = arith.addf %16, %21 : vector<8x128xf32>
    %c0_27 = arith.constant 0 : index
    %c0_28 = arith.constant 0 : index
    %23 = vector.load %arg4[%c0_27, %c0_28] : memref<1x128xf32, #tpu.memory_space<vmem>>, vector<1x128xf32>
    %24 = vector.broadcast %23 : vector<1x128xf32> to vector<8x128xf32>
    %25 = arith.addf %22, %24 : vector<8x128xf32>
    %c0_29 = arith.constant 0 : index
    %c0_30 = arith.constant 0 : index
    %c0_31 = arith.constant 0 : index
    %26 = vector.load %arg5[%c0_29, %c0_30, %c0_31] : memref<1x8x128xf32, #tpu.memory_space<vmem>>, vector<1x8x128xf32>
    %27 = vector.shape_cast %26 : vector<1x8x128xf32> to vector<8x128xf32>
    %28 = vector.shape_cast %25 : vector<8x128xf32> to vector<1x8x128xf32>
    tpu.vector_store %arg5[%c0_29, %c0_30, %c0_31], %28 {strides = array<i32>} : memref<1x8x128xf32, #tpu.memory_space<vmem>>, vector<1x8x128xf32>,
    return
  }
  func.func @transform_0(%arg0: i32, %arg1: i32) -> (i32, i32, i32, i32) {
    %c0_i32 = arith.constant 0 : i32
    %c0_i32_0 = arith.constant 0 : i32
    %c0_i32_1 = arith.constant 0 : i32
    return %arg0, %c0_i32, %arg1, %c0_i32_0 : i32, i32, i32, i32
  }
  func.func @transform_1(%arg0: i32, %arg1: i32) -> (i32, i32, i32) {
    %c0_i32 = arith.constant 0 : i32
    %c0_i32_0 = arith.constant 0 : i32
    %c0_i32_1 = arith.constant 0 : i32
    %c0_i32_2 = arith.constant 0 : i32
    return %c0_i32, %c0_i32_0, %c0_i32_1 : i32, i32, i32
  }
  func.func @transform_2(%arg0: i32, %arg1: i32) -> (i32, i32) {
    %c0_i32 = arith.constant 0 : i32
    %c0_i32_0 = arith.constant 0 : i32
    %c0_i32_1 = arith.constant 0 : i32
    return %c0_i32, %c0_i32_0 : i32, i32
  }
  func.func @transform_3(%arg0: i32, %arg1: i32) -> (i32, i32, i32) {
    %c0_i32 = arith.constant 0 : i32
    %c0_i32_0 = arith.constant 0 : i32
    return %arg0, %arg1, %c0_i32 : i32, i32, i32
  }
}

</mosaic_0001>

<bundles_post_ra>
// kernel: patch_embed_1d.1
= control target key start
LH: loop header
LB: loop body
LE: loop exit
PB: predicated region body
PF: predicated region fallthrough
CT: control target
= control target key end

     0   :  { %8 = vsyncpa [#allocation3], 0  ;;  %s969_s0 = inlined_call_operand.vmem [shape: f32[2,4,8,2], index: 0, kind: input, shape index: {}]   ;;  %s970_s1 = inlined_call_operand.vmem [shape: f32[4,2,128], index: 1, kind: input, shape index: {}]   ;;  %s971_s2 = inlined_call_operand.vmem [shape: f32[1,128], index: 2, kind: input, shape index: {}]   ;;  %s972_s3 = inlined_call_operand.hbm [shape: f32[2,8,128], index: 3, kind: output, shape index: {}]  }
   0x1   :  { %10 = vsyncpa [#allocation3 + $0x1], 0  ;;  %s830_s12 = smov 0   ;;  %s832_s13 = smov 0  }
   0x2   :  { %s834_s14 = smov 0   ;;  %s836_s15 = smov 0  }
   0x3   :  { %s838_s16 = smov 0   ;;  %s840_s17 = smov 0  }
   0x4 LB: > { %s614_s18 = sadd.s32 4294967295, %s805_s17   ;;  %s615_s19 = sadd.s32 4294967294, %s805_s17   ;;  %s805_s17 = sphi %s840_s17, %s16_s17   ;;  %s801_s16 = sphi %s838_s16, %s979_s16   ;;  %s797_s15 = sphi %s836_s15, %s978_s15   ;;  %s793_s14 = sphi %s834_s14, %s977_s14   ;;  %s789_s13 = sphi %s832_s13, %s976_s13   ;;  %s785_s12 = sphi %s830_s12, %s975_s12  }
   0x5   : > { %s28_s20 = sadd.s32 1, %s801_s16  ;;  %s107_s21 = sadd.s32 1, %s793_s14 }
   0x6   : > { %p30_p0 = scmp.ge.s32.totalorder %s28_s20, 2  ;;  %p117_p1 = scmp.ne.s32.totalorder %s793_s14, %s789_s13 }
   0x7   : > { %p118_p2 = scmp.eq.s32.totalorder %s614_s18, 1  ;;  %p123_p3 = scmp.ne.s32.totalorder %s789_s13, %s785_s12 }
   0x8   : > { %s981_s20 = smov (%p30_p0, %s28_s20), 0  ;;  %p124_p5 = scmp.eq.s32.totalorder %s615_s19, 1 }
   0x9   : > { %p870_p4 = por %p118_p2, %p117_p1  ;;  %s102_s23 = ssub.s32 %s801_s16, %s981_s20 }
   0xa   : > { %p618_p6 = scmp.ge.s32.totalorder %s805_s17, 1  ;;  %p105_p7 = scmp.eq.s32.totalorder %s102_s23, 0 }
   0xb   : > { %p877_p8 = por %p124_p5, %p123_p3  ;;  %p159_p9 = scmp.lt.s32.totalorder %s805_s17, 3 }
   0xc   : > { %s883_s25 = scalar_select %p105_p7, %s793_s14, %s107_s21  }
   0xd   : > { %p160_p10 = pnand %p618_p6, %p159_p9 }
   0xe   : > { %v623_v0 = vld [vmem:[%s970_s1 + $0x2] sm:$0x3] (!%p160_p10)  ;;  %vm204_vm0 = vcmask (!%p160_p10), 1041408   ;;  %p186_p11 = scmp.lt.s32.totalorder (!%p160_p10), %s797_s15, 1  ;;  %v807_v1 = vmov (!%p160_p10), 0.0   ;;  %vm808_vm1 = vmmov (!%p160_p10), 0  }
   0xf   : > { %163 = sbr.rel (%p160_p10) target bundleno = 263 (0x107), region = 32  ;;  %650 = vmatprep.subr.mxu0 (!%p160_p10), %v807_v1  ;;  %655 = vmatprep.subr.mxu1 (!%p160_p10), %v807_v1  ;;  %v195_v2 = vld [vmem:[%s970_s1] sm:$0x3] (!%p160_p10)  ;;  %vm200_vm2 = vcmask (!%p160_p10), 15360   ;;  %v629_v3 = vld [vmem:[%s970_s1 + $0x4] sm:$0x3] (!%p160_p10) }
  0x10   : > { %651 = vmatpush3.msk.msra.mxu0 (!%p160_p10), %vm204_vm0, %v623_v0  ;;  %652 = vmatprep.mubr.msk.f32.mxu0 (!%p160_p10), %vm808_vm1, %v807_v1  ;;  %v633_v4 = vld [vmem:[%s970_s1 + $0x6] sm:$0x3] (!%p160_p10)  ;;  %s183_s18 = sand.u32 (!%p160_p10), 1, %s789_s13   ;;  %v636_v19 = vld [vmem:[%s971_s2] ss:$0 sm:$0xff] (!%p160_p10)  ;;  %s638_s26 = sshll.u32 (!%p160_p10), %s797_s15, 7 }
  0x11   : > { %656 = vmatpush3.msk.msra.mxu1 (!%p160_p10), %vm204_vm0, %v195_v2  ;;  %657 = vmatprep.mubr.msk.f32.mxu1 (!%p160_p10), %vm808_vm1, %v807_v1  ;;  %s619_s19 = sshll.u32 (!%p160_p10), %s183_s18, 3  ;;  %s526_s5 = scalar_lea.sflag (!%p160_p10), [#allocation3], %s183_s18 }
  0x12   : > { %660 = vmatprep.subr.mxu0 (!%p160_p10), %v807_v1  ;;  %665 = vmatprep.subr.mxu1 (!%p160_p10), %v807_v1  ;;  %s185_s27 = scalar_lea.vmem (!%p160_p10), [#allocation2], %s619_s19 }
  0x13   : > { %s540_s28 = sshll.u32 (!%p160_p10), %s185_s27, 4  ;;  %s924_s28 = int_to_ptr.vmem [resolvable:$true] %s540_s28 }
  0x14   : > { %s727_s6 = scalar_lea.vmem (!%p160_p10), %s924_s28, 128 }
  0x15   : > { %p728_p12 = scmp.ne.s32.totalorder (!%p160_p10), %s924_s28, %s727_s6 }
  0x16   : > { %s187_s30 = scalar_select %p186_p11, %s797_s15, 1 }
  0x17   : > { %p729_p13 = pnand %p728_p12, %p870_p4  ;;  %s809_s15 = smov [#allocation2]  }
  0x18   : > { %s641_s4 = sshll.u32 %s187_s30, 5 }
  0x19   : > { %s193_s7 = scalar_lea.vmem %s969_s0, %s641_s4  ;;  %s922_s4 = scalar_lea.hbm %s972_s3, %s638_s26 }
  0x1a   : > { %v622_v5 = vld [vmem:[%s193_s7 + $0x8] sm:$0xff]  ;;  %v194_v6 = vld [vmem:[%s193_s7] sm:$0xff]  ;;  %v628_v7 = vld [vmem:[%s193_s7 + $0x10] sm:$0xff]  ;;  %p730_p0 = pneg %p729_p13 }
  0x1b   : > { %653 = vmatmul.mubr.msk.f32.vlgmr.msra.gmra.mrb[0].mxu0 %vm200_vm2, %v622_v5  ;;  %658 = vmatmul.mubr.msk.f32.vlgmr.msra.gmra.mrb[0].mxu1 %vm200_vm2, %v194_v6  ;;  %v632_v8 = vld [vmem:[%s193_s7 + $0x18] sm:$0xff]  ;;  %s731_s7 = sshll.u32 %s809_s15, 4  ;;  %s732_s7 = int_to_ptr.vmem [resolvable:$false] %s731_s7 }
  0x1c   : > { %661 = vmatpush3.msk.msra.mxu0 %vm204_vm0, %v629_v3  ;;  %666 = vmatpush3.msk.msra.mxu1 %vm204_vm0, %v633_v4  ;;  %s733_s8 = scalar_lea.vmem %s732_s7, 256  ;;  %p734_p1 = scmp.lt.s32.totalorder %s924_s28, %s732_s7 }
  0x1d   : > { %662 = vmatprep.mubr.msk.f32.mxu0 %vm808_vm1, %v807_v1  ;;  %667 = vmatprep.mubr.msk.f32.mxu1 %vm808_vm1, %v807_v1  ;;  %p735_p2 = scmp.lt.s32.totalorder %s733_s8, %s727_s6 }
  0x1f   : > { %663 = vmatmul.mubr.msk.f32.vlgmr.msra.gmra.mrb[2].mxu0 %vm200_vm2, %v628_v7  ;;  %668 = vmatmul.mubr.msk.f32.vlgmr.msra.gmra.mrb[2].mxu1 %vm200_vm2, %v632_v8  ;;  %p736_p3 = por %p735_p2, %p734_p1 }
  0x21   : > { %p737_p5 = pnand %p736_p3, %p730_p0 }
  0xee   : > { %v274_v9 = vpop.f32.mrb[0].mxu0  ;;  %v350_v10 = vpop.f32.mrb[0].mxu1 }
  0xef   : > { %v351_v11 = vadd.f32 %v350_v10, %v274_v9  ;;  %v654_v12 = vpop.f32.mrb[1].mxu0  ;;  %v659_v13 = vpop.f32.mrb[1].mxu1 }
  0xf2   : > { %v430_v14 = vpop.f32.mrb[2].mxu0  ;;  %v511_v15 = vpop.f32.mrb[2].mxu1 }
  0xf3   : > { %v434_v16 = vadd.f32 %v430_v14, %v351_v11  ;;  %v664_v17 = vpop.f32.mrb[3].mxu0  ;;  %v669_v18 = vpop.f32.mrb[3].mxu1 }
  0xf5   : > { %v515_v20 = vadd.f32 %v511_v15, %v434_v16 }
  0xf7   : > { %v523_v21 = vadd.f32 %v636_v19, %v515_v20 }
  0xf9   : > { %524 = vst [vmem:[%s185_s27] sm:$0xff] %v523_v21 }
  0xfa   : > { %740 = shalt.err (!%p737_p5)
}
  0xfb   : > { %s741_s9 = scalar_lea.hbm %s922_s4, 128  ;;  %s745_s18 = scalar_lea.hbm %s972_s3, 256 }
  0xfc   : > { %p742_p6 = scmp.ne.s32.totalorder %s922_s4, %s741_s9  ;;  %p746_p10 = scmp.lt.u32.totalorder %s922_s4, %s972_s3 }
  0xfd   : > { %p747_p11 = scmp.lt.u32.totalorder %s745_s18, %s741_s9  ;;  %p749_p13 = scmp.lt.u32.totalorder %s741_s9, %s922_s4 }
  0xfe   : > { %p743_p7 = pnand %p742_p6, %p870_p4 }
  0xff   : > { %p748_p12 = por %p747_p11, %p746_p10 }
 0x100   : > { %p744_p9 = pneg %p743_p7 }
 0x101   : > { %p750_p0 = por %p749_p13, %p748_p12 }
 0x103   : > { %p751_p1 = pnand %p750_p0, %p744_p9 }
 0x105   : > { %754 = shalt.err (!%p751_p1)
}
 0x106   : > { %670 = dma.vmem_to_hbm [thread:$0]  (%p870_p4), %s924_s28, 128, %s922_s4, %s526_s5  }
 0x107 PF: > { %p676_p2 = scmp.ge.s32.totalorder %s805_s17, 2  ;;  %s552_s23 = sand.u32 1, %s785_s12  }
 0x108   : > { %s553_s26 = scalar_lea.sflag [#allocation3], %s552_s23 }
 0x109   : > { %p673_p3 = pnand %p676_p2, %p877_p8 }
 0x10b   : > { %780 = dma.done.wait (!%p673_p3), %s553_s26, 128  }
 0x10c   : > { %782 = vsyncadd (!%p673_p3), %s553_s26, 4294967168  ;;  %s16_s17 = sadd.s32 1, %s805_s17   ;;  %s975_s12 = smov %s789_s13 }
 0x10d   : > { %p13_p5 = scmp.ge.s32.totalorder %s16_s17, 4   ;;  %s976_s13 = smov %s793_s14 }
 0x10e   : > { %s977_s14 = smov %s883_s25  ;;  %s978_s15 = smov %s801_s16 }
 0x10f   : > { %s979_s16 = smov %s981_s20  ;;  %15 = sbr.rel (!%p13_p5) target bundleno = 4 (0x4), region = 73 }
 0x116   :  { %558 = vsyncpa [#allocation3], 1 }
 0x117   :  { %560 = vsyncpa [#allocation3 + $0x1], 1 }

</bundles_post_ra>
